<compile_context>
chip_gen: v6e
topology: v6e:2x2x1
jax: 0.10.0
libtpu: 0.0.40
codegen_flags: <defaults>
</compile_context>

<pallas_src>
import functools
import math

import jax
import jax.numpy as jnp
from jax.experimental import pallas as pl
from jax.experimental.pallas import tpu as pltpu


def _layernorm(x, gamma, beta, eps=1e-5):
    # PyTorch nn.LayerNorm: biased variance over last dim, eps=1e-5
    mean = jnp.mean(x, axis=-1, keepdims=True)
    var = jnp.mean((x - mean) ** 2, axis=-1, keepdims=True)
    return (x - mean) * jax.lax.rsqrt(var + eps) * gamma + beta


def encoder_kernel(x_ref, wslab_ref, vecs_ref, o_ref, *, head_num):
    B, T, D = x_ref.shape
    H = head_num
    hd = D // H
    Dh = D // 2

    # (B, T, D) -> (B*T, D): tile-aligned leading-dim merge (T = 8 sublanes per batch)
    x2 = x_ref[...].reshape(B * T, D)

    # ---- unpack packed parameter slabs (static slices of resident VMEM) -----
    wqkv = wslab_ref[:, 0:3 * D]                       # (D, 3D)  Q columns pre-scaled
    wo   = wslab_ref[:, 3 * D:4 * D]                   # (D, D)   rows in head-concat order
    w1   = wslab_ref[:, 4 * D:4 * D + Dh]              # (D, Dh)
    w2t  = wslab_ref[:, 4 * D + Dh:4 * D + 2 * Dh]     # (D, Dh) == W2^T

    bqkv = vecs_ref[0:1, :]                            # (1, 3D)
    bo   = vecs_ref[1:2, 0:D]
    g1   = vecs_ref[2:3, 0:D]
    be1  = vecs_ref[3:4, 0:D]
    b1   = vecs_ref[4:5, 0:Dh]
    b2   = vecs_ref[5:6, 0:D]
    g2   = vecs_ref[6:7, 0:D]
    be2  = vecs_ref[7:8, 0:D]

    # ---- fused QKV projection: one MXU matmul for Q, K, V of every head -----
    qkv = jnp.dot(x2, wqkv, preferred_element_type=jnp.float32) + bqkv   # (B*T, 3D)

    q = qkv[:, 0:D].reshape(B, T, D)
    k = qkv[:, D:2 * D].reshape(B, T, D)
    v = qkv[:, 2 * D:3 * D].reshape(B, T, D)

    # ---- attention (static head loop, batched over B); head-sum folded into
    #      the output projection via accumulating per-head matmuls -------------
    attn = jnp.broadcast_to(bo, (B * T, D))
    for h in range(H):
        lo, hi = h * hd, (h + 1) * hd
        q_h = q[:, :, lo:hi]                           # (B, T, hd)
        k_h = k[:, :, lo:hi]
        v_h = v[:, :, lo:hi]
        s = jnp.einsum('btd,bsd->bts', q_h, k_h,
                       preferred_element_type=jnp.float32)        # (B, T, T)
        s = s - jnp.max(s, axis=-1, keepdims=True)
        p = jnp.exp(s)
        p = p / jnp.sum(p, axis=-1, keepdims=True)                 # exact softmax
        ctx = jnp.einsum('bts,bsd->btd', p, v_h,
                         preferred_element_type=jnp.float32)       # (B, T, hd)
        # per-head out-projection, accumulated (== concat(heads) @ Wo, no concat)
        attn = attn + jnp.dot(ctx.reshape(B * T, hd), wo[lo:hi, :],
                              preferred_element_type=jnp.float32)  # (B*T, D)

    # dropout(p=0.1) -> identity (deterministic inference); residual + LayerNorm
    h1 = _layernorm(x2 + attn, g1, be1)

    # ---- feed-forward: D -> D/2 -> D -----------------------------------------
    f = jnp.dot(h1, w1, preferred_element_type=jnp.float32) + b1
    f = jnp.maximum(f, 0.0)
    # W2 stored transposed in the slab -> trans-B matmul (contract rhs last dim)
    f = jnp.einsum('mk,nk->mn', f, w2t, preferred_element_type=jnp.float32) + b2

    h2 = _layernorm(h1 + f, g2, be2)
    o_ref[...] = h2.reshape(B, T, D).astype(o_ref.dtype)


def init_params(key, embed_dim):
    """Deterministic synthetic parameters in PyTorch-like (in, out) layout."""
    D, Dh = embed_dim, embed_dim // 2
    ks = jax.random.split(key, 12)
    sd = 0.05

    def w(k, shape):
        return sd * jax.random.normal(k, shape, jnp.float32)

    return dict(
        wq=w(ks[0], (D, D)),  bq=w(ks[1], (D,)),
        wk=w(ks[2], (D, D)),  bk=w(ks[3], (D,)),
        wv=w(ks[4], (D, D)),  bv=w(ks[5], (D,)),
        wo=w(ks[6], (D, D)),  bo=w(ks[7], (D,)),
        g1=jnp.ones((D,), jnp.float32),  be1=jnp.zeros((D,), jnp.float32),
        w1=w(ks[8], (D, Dh)), b1=w(ks[9], (Dh,)),
        w2=w(ks[10], (Dh, D)), b2=w(ks[11], (D,)),
        g2=jnp.ones((D,), jnp.float32),  be2=jnp.zeros((D,), jnp.float32),
    )


def prepare_kernel_params(p, head_num):
    """Pack 13 tensors into 2 slabs; fuse QKV; fold 1/sqrt(hd) into Q columns."""
    D = p["wq"].shape[0]
    Dh = D // 2
    hd = D // head_num
    scale = 1.0 / math.sqrt(hd)

    wqkv = jnp.concatenate([p["wq"] * scale, p["wk"], p["wv"]], axis=1)   # (D, 3D)
    bqkv = jnp.concatenate([p["bq"] * scale, p["bk"], p["bv"]])           # (3D,)

    # Weight slab (D, 3D + D + Dh + Dh) = (32, 160): [Wqkv | Wo | W1 | W2^T]
    wslab = jnp.concatenate([wqkv, p["wo"], p["w1"], p["w2"].T], axis=1)

    # Vector slab (8, 3D) = (8, 96): row 0 = bqkv; other rows zero-padded to 3D lanes
    pad = lambda vv: jnp.pad(vv, (0, 3 * D - vv.shape[0]))
    vecs = jnp.stack([bqkv, pad(p["bo"]), pad(p["g1"]), pad(p["be1"]),
                      pad(p["b1"]), pad(p["b2"]), pad(p["g2"]), pad(p["be2"])])
    return wslab, vecs


def encoder_forward(x, wslab, vecs, head_num):
    B, T, D = x.shape
    kernel = functools.partial(encoder_kernel, head_num=head_num)
    vmem = pl.BlockSpec(memory_space=pltpu.MemorySpace.VMEM)   # whole array, resident
    # Single invocation (no grid): on v5e/v6e this is strictly better than a 2-step
    # batch loop; on v7x a ("parallel",) batch grid could be benchmarked against this.
    return pl.pallas_call(
        kernel,
        out_shape=jax.ShapeDtypeStruct((B, T, D), jnp.float32),
        in_specs=[vmem, vmem, vmem],
        out_specs=vmem,
    )(x, wslab, vecs)


def encoder_reference(x, p, head_num):
    """Pure-JAX reference with PyTorch semantics (exact softmax)."""
    B, T, D = x.shape
    hd = D // head_num

    def ln(v, g, b):
        m = v.mean(-1, keepdims=True)
        var = ((v - m) ** 2).mean(-1, keepdims=True)
        return (v - m) / jnp.sqrt(var + 1e-5) * g + b

    q = x @ p["wq"] + p["bq"]
    k = x @ p["wk"] + p["bk"]
    v = x @ p["wv"] + p["bv"]
    qh = q.reshape(B, T, head_num, hd).transpose(0, 2, 1, 3)
    kh = k.reshape(B, T, head_num, hd).transpose(0, 2, 1, 3)
    vh = v.reshape(B, T, head_num, hd).transpose(0, 2, 1, 3)
    s = (qh @ kh.transpose(0, 1, 3, 2)) / math.sqrt(hd)
    pw = jax.nn.softmax(s, axis=-1)
    ctx = (pw @ vh).transpose(0, 2, 1, 3).reshape(B, T, D)
    attn = ctx @ p["wo"] + p["bo"]
    h1 = ln(x + attn, p["g1"], p["be1"])
    f = jnp.maximum(h1 @ p["w1"] + p["b1"], 0.0)
    f = f @ p["w2"] + p["b2"]
    return ln(h1 + f, p["g2"], p["be2"])


if __name__ == "__main__":
    B, T, D, H = 2, 8, 32, 4   # batch, seq, embed_dim, head_num

    key = jax.random.PRNGKey(0)
    kx, kp = jax.random.split(key)
    x = jax.random.normal(kx, (B, T, D), jnp.float32)
    params = init_params(kp, D)
    wslab, vecs = prepare_kernel_params(params, H)

    out = jax.block_until_ready(encoder_forward(x, wslab, vecs, H))
    ref = encoder_reference(x, params, H)

    assert out.shape == (B, T, D)
    assert jnp.all(jnp.isfinite(out))
    # Exact in-kernel softmax -> only fp32 reassociation differences vs reference.
    assert jnp.allclose(out, ref, atol=1e-4, rtol=1e-4), float(jnp.max(jnp.abs(out - ref)))
    print("KERNEL_OK")
</pallas_src>

<mosaic_0001>
module attributes {stable_mosaic.version = 11 : i64} {
  func.func @encoder_kernel(%arg0: memref<2x8x32xf32, #tpu.memory_space<vmem>>, %arg1: memref<32x160xf32, #tpu.memory_space<vmem>>, %arg2: memref<8x96xf32, #tpu.memory_space<vmem>>, %arg3: memref<2x8x32xf32, #tpu.memory_space<vmem>>) attributes {dimension_semantics = [], scalar_prefetch = 0 : i64, scratch_operands = 0 : i64, tpu.core_type = #tpu.core_type<tc>} {
    %c0 = arith.constant 0 : index
    %c0_0 = arith.constant 0 : index
    %c0_1 = arith.constant 0 : index
    %0 = vector.load %arg0[%c0, %c0_0, %c0_1] : memref<2x8x32xf32, #tpu.memory_space<vmem>>, vector<2x8x32xf32>
    %1 = vector.shape_cast %0 : vector<2x8x32xf32> to vector<16x32xf32>
    %c0_2 = arith.constant 0 : index
    %c0_3 = arith.constant 0 : index
    %2 = vector.load %arg1[%c0_2, %c0_3] : memref<32x160xf32, #tpu.memory_space<vmem>>, vector<32x96xf32>
    %c0_4 = arith.constant 0 : index
    %c96 = arith.constant 96 : index
    %3 = vector.load %arg1[%c0_4, %c96] : memref<32x160xf32, #tpu.memory_space<vmem>>, vector<32x32xf32>
    %c0_5 = arith.constant 0 : index
    %c128 = arith.constant 128 : index
    %4 = vector.load %arg1[%c0_5, %c128] : memref<32x160xf32, #tpu.memory_space<vmem>>, vector<32x16xf32>
    %c0_6 = arith.constant 0 : index
    %c144 = arith.constant 144 : index
    %5 = vector.load %arg1[%c0_6, %c144] : memref<32x160xf32, #tpu.memory_space<vmem>>, vector<32x16xf32>
    %c0_7 = arith.constant 0 : index
    %c0_8 = arith.constant 0 : index
    %6 = vector.load %arg2[%c0_7, %c0_8] : memref<8x96xf32, #tpu.memory_space<vmem>>, vector<1x96xf32>
    %c1 = arith.constant 1 : index
    %c0_9 = arith.constant 0 : index
    %7 = vector.load %arg2[%c1, %c0_9] : memref<8x96xf32, #tpu.memory_space<vmem>>, vector<1x32xf32>
    %c2 = arith.constant 2 : index
    %c0_10 = arith.constant 0 : index
    %8 = vector.load %arg2[%c2, %c0_10] : memref<8x96xf32, #tpu.memory_space<vmem>>, vector<1x32xf32>
    %c3 = arith.constant 3 : index
    %c0_11 = arith.constant 0 : index
    %9 = vector.load %arg2[%c3, %c0_11] : memref<8x96xf32, #tpu.memory_space<vmem>>, vector<1x32xf32>
    %c4 = arith.constant 4 : index
    %c0_12 = arith.constant 0 : index
    %10 = vector.load %arg2[%c4, %c0_12] : memref<8x96xf32, #tpu.memory_space<vmem>>, vector<1x16xf32>
    %c5 = arith.constant 5 : index
    %c0_13 = arith.constant 0 : index
    %11 = vector.load %arg2[%c5, %c0_13] : memref<8x96xf32, #tpu.memory_space<vmem>>, vector<1x32xf32>
    %c6 = arith.constant 6 : index
    %c0_14 = arith.constant 0 : index
    %12 = vector.load %arg2[%c6, %c0_14] : memref<8x96xf32, #tpu.memory_space<vmem>>, vector<1x32xf32>
    %c7 = arith.constant 7 : index
    %c0_15 = arith.constant 0 : index
    %13 = vector.load %arg2[%c7, %c0_15] : memref<8x96xf32, #tpu.memory_space<vmem>>, vector<1x32xf32>
    %cst = arith.constant dense<0.000000e+00> : vector<16x96xf32>
    %14 = tpu.matmul %1, %2, %cst {dimension_numbers = #tpu.dot_dimension_numbers<[1], [0], [0], [1], [0, 0, 1, 1], [], []>} : vector<16x32xf32>, vector<32x96xf32>, vector<16x96xf32> -> vector<16x96xf32>
    %15 = vector.broadcast %6 : vector<1x96xf32> to vector<16x96xf32>
    %16 = arith.addf %14, %15 : vector<16x96xf32>
    %17 = vector.extract_strided_slice %16 {offsets = [0, 0], sizes = [16, 32], strides = [1, 1]} : vector<16x96xf32> to vector<16x32xf32>
    %18 = vector.shape_cast %17 : vector<16x32xf32> to vector<2x8x32xf32>
    %19 = vector.extract_strided_slice %16 {offsets = [0, 32], sizes = [16, 32], strides = [1, 1]} : vector<16x96xf32> to vector<16x32xf32>
    %20 = vector.shape_cast %19 : vector<16x32xf32> to vector<2x8x32xf32>
    %21 = vector.extract_strided_slice %16 {offsets = [0, 64], sizes = [16, 32], strides = [1, 1]} : vector<16x96xf32> to vector<16x32xf32>
    %22 = vector.shape_cast %21 : vector<16x32xf32> to vector<2x8x32xf32>
    %23 = vector.shape_cast %7 : vector<1x32xf32> to vector<1x32xf32>
    %24 = vector.broadcast %23 : vector<1x32xf32> to vector<16x32xf32>
    %25 = vector.extract_strided_slice %18 {offsets = [0, 0, 0], sizes = [2, 8, 8], strides = [1, 1, 1]} : vector<2x8x32xf32> to vector<2x8x8xf32>
    %26 = vector.extract_strided_slice %20 {offsets = [0, 0, 0], sizes = [2, 8, 8], strides = [1, 1, 1]} : vector<2x8x32xf32> to vector<2x8x8xf32>
    %27 = vector.extract_strided_slice %22 {offsets = [0, 0, 0], sizes = [2, 8, 8], strides = [1, 1, 1]} : vector<2x8x32xf32> to vector<2x8x8xf32>
    "tpu.trace_start"() <{level = 10 : i32, message = "btd,bsd->bts"}> : () -> ()
    %cst_16 = arith.constant dense<0.000000e+00> : vector<2x8x8xf32>
    %28 = tpu.matmul %25, %26, %cst_16 {dimension_numbers = #tpu.dot_dimension_numbers<[2], [2], [1], [1], [0, 0, 0, 1, 1, 1], [0], [0]>} : vector<2x8x8xf32>, vector<2x8x8xf32>, vector<2x8x8xf32> -> vector<2x8x8xf32>
    "tpu.trace_stop"() : () -> ()
    %cst_17 = arith.constant dense<0xFF800000> : vector<2x8xf32>
    %29 = vector.multi_reduction <maximumf>, %28, %cst_17 [2] : vector<2x8x8xf32> to vector<2x8xf32>
    %30 = vector.shape_cast %29 : vector<2x8xf32> to vector<2x8x1xf32>
    %31 = vector.broadcast %30 : vector<2x8x1xf32> to vector<2x8x8xf32>
    %32 = arith.subf %28, %31 : vector<2x8x8xf32>
    %33 = math.exp %32 : vector<2x8x8xf32>
    %cst_18 = arith.constant dense<0.000000e+00> : vector<2x8xf32>
    %34 = vector.multi_reduction <add>, %33, %cst_18 [2] : vector<2x8x8xf32> to vector<2x8xf32>
    %35 = vector.shape_cast %34 : vector<2x8xf32> to vector<2x8x1xf32>
    %36 = vector.broadcast %35 : vector<2x8x1xf32> to vector<2x8x8xf32>
    %37 = arith.divf %33, %36 : vector<2x8x8xf32>
    "tpu.trace_start"() <{level = 10 : i32, message = "bts,bsd->btd"}> : () -> ()
    %cst_19 = arith.constant dense<0.000000e+00> : vector<2x8x8xf32>
    %38 = tpu.matmul %37, %27, %cst_19 {dimension_numbers = #tpu.dot_dimension_numbers<[2], [1], [1], [2], [0, 0, 0, 1, 1, 2], [0], [0]>} : vector<2x8x8xf32>, vector<2x8x8xf32>, vector<2x8x8xf32> -> vector<2x8x8xf32>
    "tpu.trace_stop"() : () -> ()
    %39 = vector.shape_cast %38 : vector<2x8x8xf32> to vector<16x8xf32>
    %40 = vector.extract_strided_slice %3 {offsets = [0, 0], sizes = [8, 32], strides = [1, 1]} : vector<32x32xf32> to vector<8x32xf32>
    %cst_20 = arith.constant dense<0.000000e+00> : vector<16x32xf32>
    %41 = tpu.matmul %39, %40, %cst_20 {dimension_numbers = #tpu.dot_dimension_numbers<[1], [0], [0], [1], [0, 0, 1, 1], [], []>} : vector<16x8xf32>, vector<8x32xf32>, vector<16x32xf32> -> vector<16x32xf32>
    %42 = arith.addf %24, %41 : vector<16x32xf32>
    %43 = vector.extract_strided_slice %18 {offsets = [0, 0, 8], sizes = [2, 8, 8], strides = [1, 1, 1]} : vector<2x8x32xf32> to vector<2x8x8xf32>
    %44 = vector.extract_strided_slice %20 {offsets = [0, 0, 8], sizes = [2, 8, 8], strides = [1, 1, 1]} : vector<2x8x32xf32> to vector<2x8x8xf32>
    %45 = vector.extract_strided_slice %22 {offsets = [0, 0, 8], sizes = [2, 8, 8], strides = [1, 1, 1]} : vector<2x8x32xf32> to vector<2x8x8xf32>
    "tpu.trace_start"() <{level = 10 : i32, message = "btd,bsd->bts"}> : () -> ()
    %cst_21 = arith.constant dense<0.000000e+00> : vector<2x8x8xf32>
    %46 = tpu.matmul %43, %44, %cst_21 {dimension_numbers = #tpu.dot_dimension_numbers<[2], [2], [1], [1], [0, 0, 0, 1, 1, 1], [0], [0]>} : vector<2x8x8xf32>, vector<2x8x8xf32>, vector<2x8x8xf32> -> vector<2x8x8xf32>
    "tpu.trace_stop"() : () -> ()
    %cst_22 = arith.constant dense<0xFF800000> : vector<2x8xf32>
    %47 = vector.multi_reduction <maximumf>, %46, %cst_22 [2] : vector<2x8x8xf32> to vector<2x8xf32>
    %48 = vector.shape_cast %47 : vector<2x8xf32> to vector<2x8x1xf32>
    %49 = vector.broadcast %48 : vector<2x8x1xf32> to vector<2x8x8xf32>
    %50 = arith.subf %46, %49 : vector<2x8x8xf32>
    %51 = math.exp %50 : vector<2x8x8xf32>
    %cst_23 = arith.constant dense<0.000000e+00> : vector<2x8xf32>
    %52 = vector.multi_reduction <add>, %51, %cst_23 [2] : vector<2x8x8xf32> to vector<2x8xf32>
    %53 = vector.shape_cast %52 : vector<2x8xf32> to vector<2x8x1xf32>
    %54 = vector.broadcast %53 : vector<2x8x1xf32> to vector<2x8x8xf32>
    %55 = arith.divf %51, %54 : vector<2x8x8xf32>
    "tpu.trace_start"() <{level = 10 : i32, message = "bts,bsd->btd"}> : () -> ()
    %cst_24 = arith.constant dense<0.000000e+00> : vector<2x8x8xf32>
    %56 = tpu.matmul %55, %45, %cst_24 {dimension_numbers = #tpu.dot_dimension_numbers<[2], [1], [1], [2], [0, 0, 0, 1, 1, 2], [0], [0]>} : vector<2x8x8xf32>, vector<2x8x8xf32>, vector<2x8x8xf32> -> vector<2x8x8xf32>
    "tpu.trace_stop"() : () -> ()
    %57 = vector.shape_cast %56 : vector<2x8x8xf32> to vector<16x8xf32>
    %58 = vector.extract_strided_slice %3 {offsets = [8, 0], sizes = [8, 32], strides = [1, 1]} : vector<32x32xf32> to vector<8x32xf32>
    %cst_25 = arith.constant dense<0.000000e+00> : vector<16x32xf32>
    %59 = tpu.matmul %57, %58, %cst_25 {dimension_numbers = #tpu.dot_dimension_numbers<[1], [0], [0], [1], [0, 0, 1, 1], [], []>} : vector<16x8xf32>, vector<8x32xf32>, vector<16x32xf32> -> vector<16x32xf32>
    %60 = arith.addf %42, %59 : vector<16x32xf32>
    %61 = vector.extract_strided_slice %18 {offsets = [0, 0, 16], sizes = [2, 8, 8], strides = [1, 1, 1]} : vector<2x8x32xf32> to vector<2x8x8xf32>
    %62 = vector.extract_strided_slice %20 {offsets = [0, 0, 16], sizes = [2, 8, 8], strides = [1, 1, 1]} : vector<2x8x32xf32> to vector<2x8x8xf32>
    %63 = vector.extract_strided_slice %22 {offsets = [0, 0, 16], sizes = [2, 8, 8], strides = [1, 1, 1]} : vector<2x8x32xf32> to vector<2x8x8xf32>
    "tpu.trace_start"() <{level = 10 : i32, message = "btd,bsd->bts"}> : () -> ()
    %cst_26 = arith.constant dense<0.000000e+00> : vector<2x8x8xf32>
    %64 = tpu.matmul %61, %62, %cst_26 {dimension_numbers = #tpu.dot_dimension_numbers<[2], [2], [1], [1], [0, 0, 0, 1, 1, 1], [0], [0]>} : vector<2x8x8xf32>, vector<2x8x8xf32>, vector<2x8x8xf32> -> vector<2x8x8xf32>
    "tpu.trace_stop"() : () -> ()
    %cst_27 = arith.constant dense<0xFF800000> : vector<2x8xf32>
    %65 = vector.multi_reduction <maximumf>, %64, %cst_27 [2] : vector<2x8x8xf32> to vector<2x8xf32>
    %66 = vector.shape_cast %65 : vector<2x8xf32> to vector<2x8x1xf32>
    %67 = vector.broadcast %66 : vector<2x8x1xf32> to vector<2x8x8xf32>
    %68 = arith.subf %64, %67 : vector<2x8x8xf32>
    %69 = math.exp %68 : vector<2x8x8xf32>
    %cst_28 = arith.constant dense<0.000000e+00> : vector<2x8xf32>
    %70 = vector.multi_reduction <add>, %69, %cst_28 [2] : vector<2x8x8xf32> to vector<2x8xf32>
    %71 = vector.shape_cast %70 : vector<2x8xf32> to vector<2x8x1xf32>
    %72 = vector.broadcast %71 : vector<2x8x1xf32> to vector<2x8x8xf32>
    %73 = arith.divf %69, %72 : vector<2x8x8xf32>
    "tpu.trace_start"() <{level = 10 : i32, message = "bts,bsd->btd"}> : () -> ()
    %cst_29 = arith.constant dense<0.000000e+00> : vector<2x8x8xf32>
    %74 = tpu.matmul %73, %63, %cst_29 {dimension_numbers = #tpu.dot_dimension_numbers<[2], [1], [1], [2], [0, 0, 0, 1, 1, 2], [0], [0]>} : vector<2x8x8xf32>, vector<2x8x8xf32>, vector<2x8x8xf32> -> vector<2x8x8xf32>
    "tpu.trace_stop"() : () -> ()
    %75 = vector.shape_cast %74 : vector<2x8x8xf32> to vector<16x8xf32>
    %76 = vector.extract_strided_slice %3 {offsets = [16, 0], sizes = [8, 32], strides = [1, 1]} : vector<32x32xf32> to vector<8x32xf32>
    %cst_30 = arith.constant dense<0.000000e+00> : vector<16x32xf32>
    %77 = tpu.matmul %75, %76, %cst_30 {dimension_numbers = #tpu.dot_dimension_numbers<[1], [0], [0], [1], [0, 0, 1, 1], [], []>} : vector<16x8xf32>, vector<8x32xf32>, vector<16x32xf32> -> vector<16x32xf32>
    %78 = arith.addf %60, %77 : vector<16x32xf32>
    %79 = vector.extract_strided_slice %18 {offsets = [0, 0, 24], sizes = [2, 8, 8], strides = [1, 1, 1]} : vector<2x8x32xf32> to vector<2x8x8xf32>
    %80 = vector.extract_strided_slice %20 {offsets = [0, 0, 24], sizes = [2, 8, 8], strides = [1, 1, 1]} : vector<2x8x32xf32> to vector<2x8x8xf32>
    %81 = vector.extract_strided_slice %22 {offsets = [0, 0, 24], sizes = [2, 8, 8], strides = [1, 1, 1]} : vector<2x8x32xf32> to vector<2x8x8xf32>
    "tpu.trace_start"() <{level = 10 : i32, message = "btd,bsd->bts"}> : () -> ()
    %cst_31 = arith.constant dense<0.000000e+00> : vector<2x8x8xf32>
    %82 = tpu.matmul %79, %80, %cst_31 {dimension_numbers = #tpu.dot_dimension_numbers<[2], [2], [1], [1], [0, 0, 0, 1, 1, 1], [0], [0]>} : vector<2x8x8xf32>, vector<2x8x8xf32>, vector<2x8x8xf32> -> vector<2x8x8xf32>
    "tpu.trace_stop"() : () -> ()
    %cst_32 = arith.constant dense<0xFF800000> : vector<2x8xf32>
    %83 = vector.multi_reduction <maximumf>, %82, %cst_32 [2] : vector<2x8x8xf32> to vector<2x8xf32>
    %84 = vector.shape_cast %83 : vector<2x8xf32> to vector<2x8x1xf32>
    %85 = vector.broadcast %84 : vector<2x8x1xf32> to vector<2x8x8xf32>
    %86 = arith.subf %82, %85 : vector<2x8x8xf32>
    %87 = math.exp %86 : vector<2x8x8xf32>
    %cst_33 = arith.constant dense<0.000000e+00> : vector<2x8xf32>
    %88 = vector.multi_reduction <add>, %87, %cst_33 [2] : vector<2x8x8xf32> to vector<2x8xf32>
    %89 = vector.shape_cast %88 : vector<2x8xf32> to vector<2x8x1xf32>
    %90 = vector.broadcast %89 : vector<2x8x1xf32> to vector<2x8x8xf32>
    %91 = arith.divf %87, %90 : vector<2x8x8xf32>
    "tpu.trace_start"() <{level = 10 : i32, message = "bts,bsd->btd"}> : () -> ()
    %cst_34 = arith.constant dense<0.000000e+00> : vector<2x8x8xf32>
    %92 = tpu.matmul %91, %81, %cst_34 {dimension_numbers = #tpu.dot_dimension_numbers<[2], [1], [1], [2], [0, 0, 0, 1, 1, 2], [0], [0]>} : vector<2x8x8xf32>, vector<2x8x8xf32>, vector<2x8x8xf32> -> vector<2x8x8xf32>
    "tpu.trace_stop"() : () -> ()
    %93 = vector.shape_cast %92 : vector<2x8x8xf32> to vector<16x8xf32>
    %94 = vector.extract_strided_slice %3 {offsets = [24, 0], sizes = [8, 32], strides = [1, 1]} : vector<32x32xf32> to vector<8x32xf32>
    %cst_35 = arith.constant dense<0.000000e+00> : vector<16x32xf32>
    %95 = tpu.matmul %93, %94, %cst_35 {dimension_numbers = #tpu.dot_dimension_numbers<[1], [0], [0], [1], [0, 0, 1, 1], [], []>} : vector<16x8xf32>, vector<8x32xf32>, vector<16x32xf32> -> vector<16x32xf32>
    %96 = arith.addf %78, %95 : vector<16x32xf32>
    %97 = arith.addf %1, %96 : vector<16x32xf32>
    %cst_36 = arith.constant dense<0.000000e+00> : vector<16xf32>
    %98 = vector.multi_reduction <add>, %97, %cst_36 [1] : vector<16x32xf32> to vector<16xf32>
    %99 = vector.shape_cast %98 : vector<16xf32> to vector<16x1xf32>
    %cst_37 = arith.constant 3.200000e+01 : f32
    %100 = vector.broadcast %cst_37 : f32 to vector<16x1xf32>
    %101 = arith.divf %99, %100 : vector<16x1xf32>
    %102 = vector.broadcast %101 : vector<16x1xf32> to vector<16x32xf32>
    %103 = arith.subf %97, %102 : vector<16x32xf32>
    %104 = arith.mulf %103, %103 : vector<16x32xf32>
    %cst_38 = arith.constant dense<0.000000e+00> : vector<16xf32>
    %105 = vector.multi_reduction <add>, %104, %cst_38 [1] : vector<16x32xf32> to vector<16xf32>
    %106 = vector.shape_cast %105 : vector<16xf32> to vector<16x1xf32>
    %cst_39 = arith.constant 3.200000e+01 : f32
    %107 = vector.broadcast %cst_39 : f32 to vector<16x1xf32>
    %108 = arith.divf %106, %107 : vector<16x1xf32>
    %109 = vector.broadcast %101 : vector<16x1xf32> to vector<16x32xf32>
    %110 = arith.subf %97, %109 : vector<16x32xf32>
    %cst_40 = arith.constant 9.99999974E-6 : f32
    %111 = vector.broadcast %cst_40 : f32 to vector<16x1xf32>
    %112 = arith.addf %108, %111 : vector<16x1xf32>
    %113 = math.rsqrt %112 : vector<16x1xf32>
    %114 = vector.broadcast %113 : vector<16x1xf32> to vector<16x32xf32>
    %115 = arith.mulf %110, %114 : vector<16x32xf32>
    %116 = vector.broadcast %8 : vector<1x32xf32> to vector<16x32xf32>
    %117 = arith.mulf %115, %116 : vector<16x32xf32>
    %118 = vector.broadcast %9 : vector<1x32xf32> to vector<16x32xf32>
    %119 = arith.addf %117, %118 : vector<16x32xf32>
    %cst_41 = arith.constant dense<0.000000e+00> : vector<16x16xf32>
    %120 = tpu.matmul %119, %4, %cst_41 {dimension_numbers = #tpu.dot_dimension_numbers<[1], [0], [0], [1], [0, 0, 1, 1], [], []>} : vector<16x32xf32>, vector<32x16xf32>, vector<16x16xf32> -> vector<16x16xf32>
    %121 = vector.broadcast %10 : vector<1x16xf32> to vector<16x16xf32>
    %122 = arith.addf %120, %121 : vector<16x16xf32>
    %cst_42 = arith.constant 0.000000e+00 : f32
    %123 = vector.broadcast %cst_42 : f32 to vector<16x16xf32>
    %124 = arith.maximumf %122, %123 : vector<16x16xf32>
    "tpu.trace_start"() <{level = 10 : i32, message = "mk,nk->mn"}> : () -> ()
    %cst_43 = arith.constant dense<0.000000e+00> : vector<16x32xf32>
    %125 = tpu.matmul %124, %5, %cst_43 {dimension_numbers = #tpu.dot_dimension_numbers<[1], [1], [0], [0], [0, 0, 1, 0], [], []>} : vector<16x16xf32>, vector<32x16xf32>, vector<16x32xf32> -> vector<16x32xf32>
    "tpu.trace_stop"() : () -> ()
    %126 = vector.broadcast %11 : vector<1x32xf32> to vector<16x32xf32>
    %127 = arith.addf %125, %126 : vector<16x32xf32>
    %128 = arith.addf %119, %127 : vector<16x32xf32>
    %cst_44 = arith.constant dense<0.000000e+00> : vector<16xf32>
    %129 = vector.multi_reduction <add>, %128, %cst_44 [1] : vector<16x32xf32> to vector<16xf32>
    %130 = vector.shape_cast %129 : vector<16xf32> to vector<16x1xf32>
    %cst_45 = arith.constant 3.200000e+01 : f32
    %131 = vector.broadcast %cst_45 : f32 to vector<16x1xf32>
    %132 = arith.divf %130, %131 : vector<16x1xf32>
    %133 = vector.broadcast %132 : vector<16x1xf32> to vector<16x32xf32>
    %134 = arith.subf %128, %133 : vector<16x32xf32>
    %135 = arith.mulf %134, %134 : vector<16x32xf32>
    %cst_46 = arith.constant dense<0.000000e+00> : vector<16xf32>
    %136 = vector.multi_reduction <add>, %135, %cst_46 [1] : vector<16x32xf32> to vector<16xf32>
    %137 = vector.shape_cast %136 : vector<16xf32> to vector<16x1xf32>
    %cst_47 = arith.constant 3.200000e+01 : f32
    %138 = vector.broadcast %cst_47 : f32 to vector<16x1xf32>
    %139 = arith.divf %137, %138 : vector<16x1xf32>
    %140 = vector.broadcast %132 : vector<16x1xf32> to vector<16x32xf32>
    %141 = arith.subf %128, %140 : vector<16x32xf32>
    %cst_48 = arith.constant 9.99999974E-6 : f32
    %142 = vector.broadcast %cst_48 : f32 to vector<16x1xf32>
    %143 = arith.addf %139, %142 : vector<16x1xf32>
    %144 = math.rsqrt %143 : vector<16x1xf32>
    %145 = vector.broadcast %144 : vector<16x1xf32> to vector<16x32xf32>
    %146 = arith.mulf %141, %145 : vector<16x32xf32>
    %147 = vector.broadcast %12 : vector<1x32xf32> to vector<16x32xf32>
    %148 = arith.mulf %146, %147 : vector<16x32xf32>
    %149 = vector.broadcast %13 : vector<1x32xf32> to vector<16x32xf32>
    %150 = arith.addf %148, %149 : vector<16x32xf32>
    %151 = vector.shape_cast %150 : vector<16x32xf32> to vector<2x8x32xf32>
    %c0_49 = arith.constant 0 : index
    %c0_50 = arith.constant 0 : index
    %c0_51 = arith.constant 0 : index
    %152 = vector.load %arg3[%c0_49, %c0_50, %c0_51] : memref<2x8x32xf32, #tpu.memory_space<vmem>>, vector<2x8x32xf32>
    tpu.vector_store %arg3[%c0_49, %c0_50, %c0_51], %151 {strides = array<i32>} : memref<2x8x32xf32, #tpu.memory_space<vmem>>, vector<2x8x32xf32>,
    return
  }
}

</mosaic_0001>

<bundles_post_ra>
// kernel: tpu_custom_call.1
= control target key start
LH: loop header
LB: loop body
LE: loop exit
PB: predicated region body
PF: predicated region fallthrough
CT: control target
= control target key end

     0   :  { %8 = vsyncpa [#allocation3], 0  ;;  %s2769_s0 = inlined_call_operand.hbm [shape: f32[2,8,32], index: 0, kind: input, shape index: {}]   ;;  %s2770_s1 = inlined_call_operand.hbm [shape: f32[32,160], index: 1, kind: input, shape index: {}]   ;;  %s2771_s2 = inlined_call_operand.hbm [shape: f32[8,96], index: 2, kind: input, shape index: {}]   ;;  %s2772_s3 = inlined_call_operand.hbm [shape: f32[2,8,32], index: 3, kind: output, shape index: {}]  }
   0x1   :  { %9 = vsyncpa [#allocation6], 0 }
   0x2   :  { %10 = vsyncpa [#allocation4], 0  ;;  %s2516_s12 = smov [#allocation5]  }
   0x3   :  { %s28_s13 = sshll.u32 %s2516_s12, 4  ;;  %s29_s13 = int_to_ptr.vmem [resolvable:$true] %s28_s13 }
   0x4   :  { %s2438_s14 = scalar_lea.vmem %s29_s13, 1024  ;;  %p2443_p1 = scmp.lt.s32.totalorder %s29_s13, %s29_s13 }
   0x5   :  { %p2439_p0 = scmp.ne.s32.totalorder %s29_s13, %s2438_s14  ;;  %p2444_p2 = scmp.lt.s32.totalorder %s2438_s14, %s2438_s14 }
   0x7   :  { %p2445_p3 = por %p2444_p2, %p2443_p1 }
   0x9   :  { %p2446_p4 = pnand %p2445_p3, %p2439_p0 }
   0xb   :  { %2449 = shalt.err (!%p2446_p4)
}
   0xc   :  { %s2517_s15 = smov 256   ;;  %s2518_s16 = smov 16  }
   0xd   :  { %34 = dma.hbm_to_vmem [thread:$0]  %s2770_s1, 1024, %s29_s13, [#allocation6], %s2517_s15, %s2517_s15, %s2518_s16  }
   0xe   :  { %s2519_s19 = smov [#allocation2]  }
   0xf   :  { %s16_s20 = sshll.u32 %s2519_s19, 4  ;;  %s17_s20 = int_to_ptr.vmem [resolvable:$true] %s16_s20 }
  0x10   :  { %s2458_s21 = scalar_lea.vmem %s17_s20, 256  ;;  %p2463_p6 = scmp.lt.s32.totalorder %s17_s20, %s17_s20 }
  0x11   :  { %p2459_p5 = scmp.ne.s32.totalorder %s17_s20, %s2458_s21  ;;  %p2464_p7 = scmp.lt.s32.totalorder %s2458_s21, %s2458_s21 }
  0x13   :  { %p2465_p8 = por %p2464_p7, %p2463_p6 }
  0x15   :  { %p2466_p9 = pnand %p2465_p8, %p2459_p5 }
  0x17   :  { %2469 = shalt.err (!%p2466_p9)
}
  0x18   :  { %s2520_s22 = smov 128   ;;  %s2521_s23 = smov 8  }
  0x19   :  { %22 = dma.hbm_to_vmem [thread:$0]  %s2769_s0, 256, %s17_s20, [#allocation3], %s2520_s22, %s2520_s22, %s2521_s23  }
  0x1a   :  { %s2522_s1 = smov [#allocation7]  }
  0x1b   :  { %s41_s26 = sshll.u32 %s2522_s1, 4  ;;  %s42_s26 = int_to_ptr.vmem [resolvable:$true] %s41_s26 }
  0x1c   :  { %s2478_s27 = scalar_lea.vmem %s42_s26, 128  ;;  %p2483_p11 = scmp.lt.s32.totalorder %s42_s26, %s42_s26 }
  0x1d   :  { %p2479_p10 = scmp.ne.s32.totalorder %s42_s26, %s2478_s27  ;;  %p2484_p12 = scmp.lt.s32.totalorder %s2478_s27, %s2478_s27 }
  0x1f   :  { %p2485_p13 = por %p2484_p12, %p2483_p11 }
  0x21   :  { %p2486_p0 = pnand %p2485_p13, %p2479_p10 }
  0x23   :  { %2489 = shalt.err (!%p2486_p0)
}
  0x24   :  { %44 = dma.hbm_to_vmem [thread:$0]  %s2771_s2, 128, %s42_s26, [#allocation6]  }
  0x25   :  { %2510 = dma.done.wait [#allocation3], 256  }
  0x26   :  { %2511 = vsyncadd [#allocation3], 4294967040 }
  0x27   :  { %2512 = dma.done.wait [#allocation6], 1152  }
  0x28   :  { %2513 = vsyncadd [#allocation6], 4294966144  ;;  %vm76_vm0 = vcmask 261120   ;;  %v2570_v0 = vld [vmem:[#allocation5 + $0x30] sm:$0xff]  ;;  %v2572_v1 = vld [vmem:[#allocation5 + $0x20] sm:$0xff]  ;;  %v2523_v6 = vmov 0.0  }
  0x29   :  { %2235 = vmatprep.subr.mxu0 %v2570_v0  ;;  %v2575_v2 = vld [vmem:[#allocation2] sm:$0xff]  ;;  %v56_v4 = vld [vmem:[#allocation5] sm:$0xff]  ;;  %v2586_v5 = vld [vmem:[#allocation2 + $0x8] sm:$0xff]  ;;  %2251 = vmatprep.subr.mxu1 %v2523_v6  ;;  %vm2524_vm1 = vmmov 0   ;;  %s2525_s0 = smov 96   ;;  %vm165_vm2 = vcmask 64512  }
  0x2a   :  { %2236 = vmatpush3.msra.mxu0 %v2570_v0  ;;  %v2578_v3 = vld [vmem:[#allocation5 + $0x10] sm:$0xff]  ;;  %2243 = vmatprep.mubr.msk.f32.mxu0 %vm76_vm0, %v2575_v2  ;;  %v2123_v8 = vld [vmem:[#allocation7] ss:$0 sm:$0xff]  ;;  %s2526_s2 = smov 64   ;;  %s2527_s30 = smov 88   ;;  %vm1973_vm3 = vcmask 130048  }
  0x2b   :  { %2237 = vmatprep.subr.mxu0 %v2572_v1  ;;  %2253 = vmatprep.mubr.msk.f32.mxu1 %vm2524_vm1, %v2523_v6  ;;  %s2528_s4 = smov 32   ;;  %s2529_s5 = smov 120  }
  0x2c   :  { %2238 = vmatpush3.msra.mxu0 %v2572_v1  ;;  %s2530_s6 = smov 56   ;;  %s2531_s7 = smov 80  }
  0x2d   :  { %2239 = vmatprep.subr.mxu0 %v2578_v3  ;;  %s2532_s8 = smov 112   ;;  %s2533_s9 = smov 48  }
  0x2e   :  { %2240 = vmatpush3.msra.mxu0 %v2578_v3  ;;  %s2534_s10 = smov 72   ;;  %s2535_s11 = smov 104  }
  0x2f   :  { %2241 = vmatprep.subr.mxu0 %v56_v4  ;;  %s2536_s12 = smov 40   ;;  %s2537_s13 = smov [#allocation8]  }
  0x30   :  { %2242 = vmatpush3.msra.mxu0 %v56_v4  ;;  %s2110_s14 = sshll.u32 %s2537_s13, 4  ;;  %s2111_s14 = int_to_ptr.vmem [resolvable:$true] %s2110_s14 }
  0x31   :  { %2244 = vmatmul.mubr.msk.f32.vlgmr.msra.gmra.mxu0 %vm76_vm0, %v2586_v5  ;;  %2246 = vmatprep.subr.mxu0 %v2523_v6  ;;  %s2490_s15 = scalar_lea.vmem %s2111_s14, 256  ;;  %p2495_p2 = scmp.lt.s32.totalorder %s2111_s14, %s2111_s14 }
  0x32   :  { %2248 = vmatprep.mubr.msk.f32.mxu0 %vm2524_vm1, %v2523_v6  ;;  %p2491_p1 = scmp.ne.s32.totalorder %s2111_s14, %s2490_s15  ;;  %p2496_p3 = scmp.lt.s32.totalorder %s2490_s15, %s2490_s15 }
  0x34   :  { %p2497_p4 = por %p2496_p3, %p2495_p2 }
  0x36   :  { %p2498_p5 = pnand %p2497_p4, %p2491_p1 }
  0xf1   :  { %v2245_v7 = vpop.f32.mrf.mxu0 }
  0xf2   :  { %v2599_v11 = vadd.f32 %v2245_v7, %v2123_v8 }
  0xf3   :  { %v149_v9 = vpop.f32.mrf.mxu0 }
  0xf4   :  { %v2596_v10 = vadd.f32 %v2123_v8, %v149_v9 }
  0xf6   :  { %163 = vrot.lane.b32.xlu0 %v2596_v10, %s2525_s0 }
  0xfa   :  { %241 = vrot.lane.b32.xlu0 %v2599_v11, %s2525_s0 }
 0x168   :  { %v164_v12 = vpop.permute.xlu0 %163 }
 0x169   :  { %2247 = vmatpush3.xpose.msk.msra.mxu0 %vm165_vm2, %v164_v12 }
 0x16a   :  { %2256 = vmatprep.subr.mxu0 %v2523_v6 }
 0x16c   :  { %2249 = vmatmul.mubr.msk.f32.vlgmr.msra.gmra.mxu0 %vm165_vm2, %v2596_v10  ;;  %v242_v13 = vpop.permute.xlu0 %241 }
 0x16d   :  { %2252 = vmatpush3.xpose.msk.msra.mxu1 %vm165_vm2, %v242_v13  ;;  %2258 = vmatprep.mubr.msk.f32.mxu0 %vm2524_vm1, %v2523_v6 }
 0x16e   :  { %2261 = vmatprep.subr.mxu1 %v2523_v6 }
 0x170   :  { %2254 = vmatmul.mubr.msk.f32.vlgmr.msra.gmra.mxu1 %vm165_vm2, %v2599_v11 }
 0x171   :  { %2263 = vmatprep.mubr.msk.f32.mxu1 %vm2524_vm1, %v2523_v6 }
 0x22c   :  { %v236_v14 = vpop.f32.mrf.mxu0 }
 0x22d   :  { %v317_v15 = vsel %vm165_vm2, %v236_v14, -inf }
 0x22e   :  { %318 = vmax.xlane.f32.xlu1 %v317_v15  ;;  %v2250_v16 = vpop.f32.mrf.mxu0 }
 0x230   :  { %v313_v17 = vpop.f32.mrf.mxu1 }
 0x231   :  { %v320_v18 = vsel %vm165_vm2, %v313_v17, -inf }
 0x232   :  { %321 = vmax.xlane.f32.xlu1 %v320_v18  ;;  %v2255_v19 = vpop.f32.mrf.mxu1 }
 0x2b7   :  { %v319_v20 = vpop.xlane.xlu1 %318 }
 0x2b8   :  { %v323_v21 = vsub.f32 %v236_v14, %v319_v20 }
 0x2ba   :  { %v325_v22 = vmul.f32 1.442695, %v323_v21 }
 0x2bb   :  { %v322_v23 = vpop.xlane.xlu1 %321 }
 0x2bc   :  { %2390 = vpow2.f32 %v325_v22  ;;  %v324_v24 = vsub.f32 %v313_v17, %v322_v23 }
 0x2be   :  { %v327_v25 = vmul.f32 1.442695, %v324_v24 }
 0x2c0   :  { %2392 = vpow2.f32 %v327_v25 }
 0x2c9   :  { %v2391_v26 = vpop.eup %2390 }
 0x2ca   :  { %v329_v27 = vsel %vm165_vm2, %v2391_v26, 0.0 }
 0x2cb   :  { %330 = vadd.xlane.f32.xlu0 %v329_v27 }
 0x2cd   :  { %v2393_v28 = vpop.eup %2392 }
 0x2ce   :  { %v332_v29 = vsel %vm165_vm2, %v2393_v28, 0.0 }
 0x2cf   :  { %333 = vadd.xlane.f32.xlu1 %v332_v29 }
 0x2e0   :  { %339 = vrot.lane.b32.xlu1 %v2596_v10, %s2526_s2 }
 0x2e1   :  { %658 = vrot.lane.b32.xlu0 %v2599_v11, %s2527_s30 }
 0x2e4   :  { %415 = vrot.lane.b32.xlu1 %v2599_v11, %s2526_s2 }
 0x2e8   :  { %492 = vrot.lane.b32.xlu1 %v56_v4, %s2528_s4 }
 0x2ec   :  { %580 = vrot.lane.b32.xlu1 %v2596_v10, %s2527_s30 }
 0x2f0   :  { %578 = vrot.lane.b32.xlu1 %v2596_v10, %s2529_s5 }
 0x2f4   :  { %656 = vrot.lane.b32.xlu1 %v2599_v11, %s2529_s5 }
 0x354   :  { %v331_v30 = vpop.xlane.xlu0 %330 }
 0x355   :  { %2394 = vrcp.f32 %v331_v30 }
 0x358   :  { %v334_v31 = vpop.xlane.xlu1 %333  ;;  %v659_v44 = vpop.permute.xlu0 %658 }
 0x359   :  { %2396 = vrcp.f32 %v334_v31 }
 0x35c   :  { %v340_v32 = vpop.permute.xlu1 %339 }
 0x35d   :  { %2257 = vmatpush3.msra.mxu0 %v340_v32 }
 0x360   :  { %v416_v33 = vpop.permute.xlu1 %415 }
 0x361   :  { %2262 = vmatpush3.msra.mxu1 %v416_v33  ;;  %v2126_v33 = vld [vmem:[#allocation7 + $0x1] ss:$0 sm:$0xff] }
 0x362   :  { %v2395_v34 = vpop.eup %2394  ;;  %2271 = vmatprep.subr.mxu1 %v2523_v6 }
 0x363   :  { %v336_v35 = vmul.f32 %v2395_v34, %v2391_v26 }
 0x364   :  { %v493_v36 = vpop.permute.xlu1 %492 }
 0x365   :  { %2259 = vmatmul.mubr.msk.f32.vlgmr.msra.gmra.mxu0 %vm165_vm2, %v336_v35  ;;  %2266 = vmatprep.subr.mxu0 %v493_v36 }
 0x366   :  { %v2397_v37 = vpop.eup %2396  ;;  %2267 = vmatpush3.msra.mxu0 %v493_v36 }
 0x367   :  { %v338_v38 = vmul.f32 %v2397_v37, %v2393_v28  ;;  %2276 = vmatprep.subr.mxu0 %v2523_v6 }
 0x368   :  { %v581_v39 = vpop.permute.xlu1 %580 }
 0x369   :  { %2264 = vmatmul.mubr.msk.f32.vlgmr.msra.gmra.mxu1 %vm165_vm2, %v338_v38 }
 0x36a   :  { %2272 = vmatpush3.xpose.msk.msra.mxu1 %vm165_vm2, %v581_v39  ;;  %2273 = vmatprep.mubr.msk.f32.mxu1 %vm2524_vm1, %v2523_v6 }
 0x36b   :  { %2281 = vmatprep.subr.mxu1 %v2523_v6 }
 0x36c   :  { %v579_v40 = vpop.permute.xlu1 %578 }
 0x36d   :  { %2274 = vmatmul.mubr.msk.f32.vlgmr.msra.gmra.mxu1 %vm165_vm2, %v579_v40 }
 0x36e   :  { %2283 = vmatprep.mubr.msk.f32.mxu1 %vm2524_vm1, %v2523_v6 }
 0x370   :  { %v657_v46 = vpop.permute.xlu1 %656 }
 0x425   :  { %v411_v41 = vpop.f32.mrf.mxu0 }
 0x426   :  { %2268 = vmatprep.mubr.msk.f32.mxu0 %vm165_vm2, %v411_v41 }
 0x427   :  { %v2260_v42 = vpop.f32.mrf.mxu0 }
 0x429   :  { %v487_v43 = vpop.f32.mrf.mxu1 }
 0x42a   :  { %2269 = vmatmul.mubr.msk.f32.vlgmr.msra.gmra.mxu0 %vm165_vm2, %v487_v43 }
 0x42b   :  { %2277 = vmatpush3.xpose.msk.msra.mxu0 %vm165_vm2, %v659_v44  ;;  %v2265_v45 = vpop.f32.mrf.mxu1  ;;  %2278 = vmatprep.mubr.msk.f32.mxu0 %vm2524_vm1, %v2523_v6 }
 0x42c   :  { %2286 = vmatprep.subr.mxu0 %v2523_v6 }
 0x42d   :  { %v652_v47 = vpop.f32.mrf.mxu1 }
 0x42e   :  { %2279 = vmatmul.mubr.msk.f32.vlgmr.msra.gmra.mxu0 %vm165_vm2, %v657_v46  ;;  %v734_v48 = vsel %vm165_vm2, %v652_v47, -inf }
 0x42f   :  { %735 = vmax.xlane.f32.xlu1 %v734_v48  ;;  %v2275_v49 = vpop.f32.mrf.mxu1  ;;  %2288 = vmatprep.mubr.msk.f32.mxu0 %vm2524_vm1, %v2523_v6 }
 0x4b8   :  { %v736_v50 = vpop.xlane.xlu1 %735 }
 0x4b9   :  { %v740_v51 = vsub.f32 %v652_v47, %v736_v50 }
 0x4bb   :  { %v742_v52 = vmul.f32 1.442695, %v740_v51 }
 0x4bd   :  { %2398 = vpow2.f32 %v742_v52 }
 0x4ca   :  { %v2399_v53 = vpop.eup %2398 }
 0x4cb   :  { %v746_v54 = vsel %vm165_vm2, %v2399_v53, 0.0 }
 0x4cc   :  { %747 = vadd.xlane.f32.xlu1 %v746_v54 }
 0x4ea   :  { %v2647_v55 = vpop.f32.mrf.mxu0 }
 0x4eb   :  { %v577_v34 = vadd.f32 %v2647_v55, %v2126_v33 }
 0x4ec   :  { %v2649_v56 = vpop.f32.mrf.mxu0 }
 0x4ed   :  { %v576_v36 = vadd.f32 %v2126_v33, %v2649_v56 }
 0x4ee   :  { %v730_v57 = vpop.f32.mrf.mxu0 }
 0x4ef   :  { %v737_v58 = vsel %vm165_vm2, %v730_v57, -inf }
 0x4f0   :  { %738 = vmax.xlane.f32.xlu0 %v737_v58  ;;  %v2280_v59 = vpop.f32.mrf.mxu0 }
 0x506   :  { %756 = vrot.lane.b32.xlu0 %v2596_v10, %s2530_s6 }
 0x50a   :  { %997 = vrot.lane.b32.xlu0 %v2596_v10, %s2531_s7 }
 0x50e   :  { %995 = vrot.lane.b32.xlu0 %v2596_v10, %s2532_s8 }
 0x555   :  { %v748_v60 = vpop.xlane.xlu1 %747 }
 0x556   :  { %2400 = vrcp.f32 %v748_v60 }
 0x563   :  { %v2401_v62 = vpop.eup %2400 }
 0x564   :  { %v753_v8 = vmul.f32 %v2401_v62, %v2399_v53 }
 0x579   :  { %v739_v61 = vpop.xlane.xlu0 %738 }
 0x57a   :  { %v741_v63 = vsub.f32 %v730_v57, %v739_v61 }
 0x57c   :  { %v744_v4 = vmul.f32 1.442695, %v741_v63 }
 0x57d   :  { %v757_v7 = vpop.permute.xlu0 %756 }
 0x57e   :  { %2402 = vpow2.f32 %v744_v4  ;;  %2282 = vmatpush3.msra.mxu1 %v757_v7 }
 0x57f   :  { %2284 = vmatmul.mubr.msk.f32.vlgmr.msra.gmra.mxu1 %vm165_vm2, %v753_v8 }
 0x581   :  { %v998_v17 = vpop.permute.xlu0 %997 }
 0x58b   :  { %v2403_v9 = vpop.eup %2402 }
 0x58c   :  { %v749_v12 = vsel %vm165_vm2, %v2403_v9, 0.0 }
 0x58d   :  { %750 = vadd.xlane.f32.xlu1 %v749_v12 }
 0x59e   :  { %832 = vrot.lane.b32.xlu1 %v2599_v11, %s2530_s6 }
 0x5a2   :  { %909 = vrot.lane.b32.xlu1 %v2578_v3, %s2528_s4  ;;  %v996_v3 = vpop.permute.xlu0 %995 }
 0x5a6   :  { %1075 = vrot.lane.b32.xlu1 %v2599_v11, %s2531_s7 }
 0x5aa   :  { %1073 = vrot.lane.b32.xlu1 %v2599_v11, %s2532_s8 }
 0x616   :  { %v751_v13 = vpop.xlane.xlu1 %750 }
 0x617   :  { %2404 = vrcp.f32 %v751_v13 }
 0x61a   :  { %v833_v14 = vpop.permute.xlu1 %832 }
 0x61b   :  { %2287 = vmatpush3.msra.mxu0 %v833_v14 }
 0x61c   :  { %2296 = vmatprep.subr.mxu0 %v2523_v6 }
 0x61e   :  { %v910_v15 = vpop.permute.xlu1 %909 }
 0x61f   :  { %2291 = vmatprep.subr.mxu1 %v910_v15 }
 0x620   :  { %2292 = vmatpush3.msra.mxu1 %v910_v15 }
 0x621   :  { %2301 = vmatprep.subr.mxu1 %v2523_v6 }
 0x622   :  { %v1076_v21 = vpop.permute.xlu1 %1075 }
 0x624   :  { %v2405_v16 = vpop.eup %2404 }
 0x625   :  { %v755_v18 = vmul.f32 %v2405_v16, %v2403_v9 }
 0x626   :  { %v1074_v24 = vpop.permute.xlu1 %1073 }
 0x627   :  { %2289 = vmatmul.mubr.msk.f32.vlgmr.msra.gmra.mxu0 %vm165_vm2, %v755_v18 }
 0x628   :  { %2297 = vmatpush3.xpose.msk.msra.mxu0 %vm165_vm2, %v998_v17  ;;  %2298 = vmatprep.mubr.msk.f32.mxu0 %vm2524_vm1, %v2523_v6 }
 0x629   :  { %2306 = vmatprep.subr.mxu0 %v2523_v6 }
 0x62b   :  { %2299 = vmatmul.mubr.msk.f32.vlgmr.msra.gmra.mxu0 %vm165_vm2, %v996_v3 }
 0x62c   :  { %2308 = vmatprep.mubr.msk.f32.mxu0 %vm2524_vm1, %v2523_v6 }
 0x63f   :  { %v828_v19 = vpop.f32.mrf.mxu1 }
 0x640   :  { %2293 = vmatprep.mubr.msk.f32.mxu1 %vm165_vm2, %v828_v19 }
 0x641   :  { %v2285_v20 = vpop.f32.mrf.mxu1 }
 0x6e7   :  { %v904_v22 = vpop.f32.mrf.mxu0 }
 0x6e8   :  { %2294 = vmatmul.mubr.msk.f32.vlgmr.msra.gmra.mxu1 %vm165_vm2, %v904_v22 }
 0x6e9   :  { %2302 = vmatpush3.xpose.msk.msra.mxu1 %vm165_vm2, %v1076_v21  ;;  %v2290_v23 = vpop.f32.mrf.mxu0  ;;  %2303 = vmatprep.mubr.msk.f32.mxu1 %vm2524_vm1, %v2523_v6 }
 0x6ea   :  { %2311 = vmatprep.subr.mxu1 %v2523_v6 }
 0x6eb   :  { %v1069_v25 = vpop.f32.mrf.mxu0 }
 0x6ec   :  { %2304 = vmatmul.mubr.msk.f32.vlgmr.msra.gmra.mxu1 %vm165_vm2, %v1074_v24  ;;  %v1151_v26 = vsel %vm165_vm2, %v1069_v25, -inf }
 0x6ed   :  { %1152 = vmax.xlane.f32.xlu0 %v1151_v26  ;;  %v2300_v27 = vpop.f32.mrf.mxu0  ;;  %2313 = vmatprep.mubr.msk.f32.mxu1 %vm2524_vm1, %v2523_v6 }
 0x776   :  { %v1153_v28 = vpop.xlane.xlu0 %1152 }
 0x777   :  { %v1157_v29 = vsub.f32 %v1069_v25, %v1153_v28 }
 0x779   :  { %v1159_v30 = vmul.f32 1.442695, %v1157_v29 }
 0x77b   :  { %2406 = vpow2.f32 %v1159_v30 }
 0x788   :  { %v2407_v31 = vpop.eup %2406 }
 0x789   :  { %v1163_v32 = vsel %vm165_vm2, %v2407_v31, 0.0 }
 0x78a   :  { %1164 = vadd.xlane.f32.xlu0 %v1163_v32 }
 0x7a8   :  { %v2295_v35 = vpop.f32.mrf.mxu1 }
 0x7a9   :  { %v2687_v37 = vadd.f32 %v2295_v35, %v577_v34 }
 0x7aa   :  { %v984_v38 = vpop.f32.mrf.mxu1 }
 0x7ab   :  { %v2689_v39 = vadd.f32 %v984_v38, %v576_v36 }
 0x7ac   :  { %v1147_v40 = vpop.f32.mrf.mxu1 }
 0x7ad   :  { %v1154_v41 = vsel %vm165_vm2, %v1147_v40, -inf }
 0x7ae   :  { %1155 = vmax.xlane.f32.xlu1 %v1154_v41  ;;  %v2305_v42 = vpop.f32.mrf.mxu1 }
 0x7bf   :  { %1173 = vrot.lane.b32.xlu1 %v2596_v10, %s2533_s9 }
 0x7c3   :  { %1326 = vrot.lane.b32.xlu1 %v2572_v1, %s2528_s4 }
 0x7c7   :  { %1414 = vrot.lane.b32.xlu1 %v2596_v10, %s2534_s10 }
 0x7cb   :  { %1412 = vrot.lane.b32.xlu1 %v2596_v10, %s2535_s11 }
 0x813   :  { %v1165_v43 = vpop.xlane.xlu0 %1164 }
 0x814   :  { %2408 = vrcp.f32 %v1165_v43 }
 0x821   :  { %v2409_v45 = vpop.eup %2408 }
 0x822   :  { %v1170_v49 = vmul.f32 %v2409_v45, %v2407_v31 }
 0x837   :  { %v1156_v44 = vpop.xlane.xlu1 %1155 }
 0x838   :  { %v1158_v46 = vsub.f32 %v1147_v40, %v1156_v44 }
 0x83a   :  { %v1161_v47 = vmul.f32 1.442695, %v1158_v46 }
 0x83b   :  { %v1174_v48 = vpop.permute.xlu1 %1173 }
 0x83c   :  { %2410 = vpow2.f32 %v1161_v47  ;;  %2307 = vmatpush3.msra.mxu0 %v1174_v48 }
 0x83d   :  { %2309 = vmatmul.mubr.msk.f32.vlgmr.msra.gmra.mxu0 %vm165_vm2, %v1170_v49 }
 0x83f   :  { %v1327_v50 = vpop.permute.xlu1 %1326 }
 0x840   :  { %2316 = vmatprep.subr.mxu0 %v1327_v50 }
 0x841   :  { %2317 = vmatpush3.msra.mxu0 %v1327_v50 }
 0x842   :  { %2326 = vmatprep.subr.mxu0 %v2523_v6 }
 0x843   :  { %v1415_v55 = vpop.permute.xlu1 %1414 }
 0x847   :  { %v1413_v57 = vpop.permute.xlu1 %1412 }
 0x849   :  { %v2411_v1 = vpop.eup %2410 }
 0x84a   :  { %v1166_v51 = vsel %vm165_vm2, %v2411_v1, 0.0 }
 0x84b   :  { %1167 = vadd.xlane.f32.xlu0 %v1166_v51 }
 0x861   :  { %1249 = vrot.lane.b32.xlu0 %v2599_v11, %s2533_s9 }
 0x865   :  { %1492 = vrot.lane.b32.xlu0 %v2599_v11, %s2534_s10 }
 0x869   :  { %1490 = vrot.lane.b32.xlu0 %v2599_v11, %s2535_s11 }
 0x8d4   :  { %v1168_v52 = vpop.xlane.xlu0 %1167 }
 0x8d5   :  { %2412 = vrcp.f32 %v1168_v52  ;;  %v63_v52 = vld [vmem:[#allocation5 + $0x38] sm:$0xff] }
 0x8d8   :  { %v1250_v53 = vpop.permute.xlu0 %1249 }
 0x8d9   :  { %2312 = vmatpush3.msra.mxu1 %v1250_v53  ;;  %v61_v53 = vld [vmem:[#allocation5 + $0x18] sm:$0xff] }
 0x8da   :  { %2321 = vmatprep.subr.mxu1 %v2523_v6 }
 0x8dc   :  { %v1493_v60 = vpop.permute.xlu0 %1492 }
 0x8e0   :  { %v1491_v63 = vpop.permute.xlu0 %1490 }
 0x8e2   :  { %v2413_v54 = vpop.eup %2412 }
 0x8e3   :  { %v1172_v56 = vmul.f32 %v2413_v54, %v2411_v1  ;;  %v60_v54 = vld [vmem:[#allocation5 + $0x8] sm:$0xff] }
 0x8e5   :  { %2314 = vmatmul.mubr.msk.f32.vlgmr.msra.gmra.mxu1 %vm165_vm2, %v1172_v56 }
 0x8e6   :  { %2322 = vmatpush3.xpose.msk.msra.mxu1 %vm165_vm2, %v1415_v55  ;;  %2323 = vmatprep.mubr.msk.f32.mxu1 %vm2524_vm1, %v2523_v6 }
 0x8e7   :  { %2331 = vmatprep.subr.mxu1 %v2523_v6 }
 0x8e9   :  { %2324 = vmatmul.mubr.msk.f32.vlgmr.msra.gmra.mxu1 %vm165_vm2, %v1413_v57 }
 0x8ea   :  { %2333 = vmatprep.mubr.msk.f32.mxu1 %vm2524_vm1, %v2523_v6 }
 0x8fd   :  { %v1245_v58 = vpop.f32.mrf.mxu0 }
 0x8fe   :  { %2318 = vmatprep.mubr.msk.f32.mxu0 %vm165_vm2, %v1245_v58 }
 0x8ff   :  { %v2310_v59 = vpop.f32.mrf.mxu0 }
 0x9a5   :  { %v1321_v61 = vpop.f32.mrf.mxu1 }
 0x9a6   :  { %2319 = vmatmul.mubr.msk.f32.vlgmr.msra.gmra.mxu0 %vm165_vm2, %v1321_v61 }
 0x9a7   :  { %2327 = vmatpush3.xpose.msk.msra.mxu0 %vm165_vm2, %v1493_v60  ;;  %v2315_v62 = vpop.f32.mrf.mxu1  ;;  %2328 = vmatprep.mubr.msk.f32.mxu0 %vm2524_vm1, %v2523_v6 }
 0x9a8   :  { %2336 = vmatprep.subr.mxu0 %v2523_v6 }
 0x9a9   :  { %v1486_v4 = vpop.f32.mrf.mxu1 }
 0x9aa   :  { %2329 = vmatmul.mubr.msk.f32.vlgmr.msra.gmra.mxu0 %vm165_vm2, %v1491_v63  ;;  %v1568_v7 = vsel %vm165_vm2, %v1486_v4, -inf }
 0x9ab   :  { %1569 = vmax.xlane.f32.xlu1 %v1568_v7  ;;  %v2325_v8 = vpop.f32.mrf.mxu1  ;;  %2338 = vmatprep.mubr.msk.f32.mxu0 %vm2524_vm1, %v2523_v6  ;;  %v2159_v7 = vld [vmem:[#allocation7 + $0x2] ss:$0 sm:$0xff] }
 0xa34   :  { %v1570_v9 = vpop.xlane.xlu1 %1569 }
 0xa35   :  { %v1574_v12 = vsub.f32 %v1486_v4, %v1570_v9  ;;  %v2160_v9 = vld [vmem:[#allocation7 + $0x3] ss:$0 sm:$0xff] }
 0xa37   :  { %v1576_v13 = vmul.f32 1.442695, %v1574_v12 }
 0xa39   :  { %2414 = vpow2.f32 %v1576_v13 }
 0xa46   :  { %v2415_v19 = vpop.eup %2414 }
 0xa47   :  { %v1580_v21 = vsel %vm165_vm2, %v2415_v19, 0.0 }
 0xa66   :  { %v2320_v14 = vpop.f32.mrf.mxu0 }
 0xa67   :  { %v1411_v15 = vadd.f32 %v2320_v14, %v2687_v37 }
 0xa68   :  { %v1401_v16 = vpop.f32.mrf.mxu0 }
 0xa69   :  { %v1410_v17 = vadd.f32 %v1401_v16, %v2689_v39 }
 0xa6a   :  { %v1564_v18 = vpop.f32.mrf.mxu0 }
 0xa6b   :  { %v1571_v3 = vsel %vm165_vm2, %v1564_v18, -inf }
 0xa6c   :  { %1572 = vmax.xlane.f32.xlu0 %v1571_v3  ;;  %v2330_v20 = vpop.f32.mrf.mxu0  ;;  %v2161_v3 = vld [vmem:[#allocation7 + $0x4] ss:$0 sm:$0xff] }
 0xa70   :  { %1581 = vadd.xlane.f32.xlu0 %v1580_v21 }
 0xa86   :  { %1590 = vrot.lane.b32.xlu0 %v2596_v10, %s2536_s12 }
 0xaf5   :  { %v1573_v6 = vpop.xlane.xlu0 %1572 }
 0xaf6   :  { %v1575_v22 = vsub.f32 %v1564_v18, %v1573_v6 }
 0xaf8   :  { %v1578_v23 = vmul.f32 1.442695, %v1575_v22 }
 0xaf9   :  { %v1582_v24 = vpop.xlane.xlu0 %1581 }
 0xafa   :  { %2416 = vpow2.f32 %v1578_v23 }
 0xafb   :  { %2418 = vrcp.f32 %v1582_v24  ;;  %v2164_v24 = vld [vmem:[#allocation7 + $0x5] ss:$0 sm:$0xff] }
 0xafd   :  { %v1591_v25 = vpop.permute.xlu0 %1590 }
 0xafe   :  { %2332 = vmatpush3.msra.mxu1 %v1591_v25 }
 0xb07   :  { %v2417_v26 = vpop.eup %2416 }
 0xb08   :  { %v2419_v27 = vpop.eup %2418  ;;  %v1583_v28 = vsel %vm165_vm2, %v2417_v26, 0.0 }
 0xb09   :  { %1584 = vadd.xlane.f32.xlu1 %v1583_v28  ;;  %v1587_v29 = vmul.f32 %v2419_v27, %v2415_v19 }
 0xb0b   :  { %2334 = vmatmul.mubr.msk.f32.vlgmr.msra.gmra.mxu1 %vm165_vm2, %v1587_v29 }
 0xb1a   :  { %1666 = vrot.lane.b32.xlu1 %v2599_v11, %s2536_s12 }
 0xb1e   :  { %1743 = vrot.lane.b32.xlu1 %v2570_v0, %s2528_s4 }
 0xb92   :  { %v1585_v10 = vpop.xlane.xlu1 %1584 }
 0xb93   :  { %2420 = vrcp.f32 %v1585_v10 }
 0xb96   :  { %v1667_v30 = vpop.permute.xlu1 %1666 }
 0xb97   :  { %2337 = vmatpush3.msra.mxu0 %v1667_v30 }
 0xb98   :  { %2346 = vmatprep.subr.mxu0 %v63_v52 }
 0xb9a   :  { %v1744_v31 = vpop.permute.xlu1 %1743 }
 0xb9b   :  { %2341 = vmatprep.subr.mxu1 %v1744_v31 }
 0xb9c   :  { %2342 = vmatpush3.msra.mxu1 %v1744_v31 }
 0xba0   :  { %v2421_v32 = vpop.eup %2420 }
 0xba1   :  { %v1589_v33 = vmul.f32 %v2421_v32, %v2417_v26 }
 0xba3   :  { %2339 = vmatmul.mubr.msk.f32.vlgmr.msra.gmra.mxu0 %vm165_vm2, %v1589_v33 }
 0xba4   :  { %2347 = vmatpush3.msra.mxu0 %v63_v52 }
 0xbcb   :  { %v1662_v34 = vpop.f32.mrf.mxu1 }
 0xbcc   :  { %2343 = vmatprep.mubr.msk.f32.mxu1 %vm165_vm2, %v1662_v34 }
 0xbcd   :  { %v2335_v35 = vpop.f32.mrf.mxu1 }
 0xc63   :  { %v1738_v36 = vpop.f32.mrf.mxu0 }
 0xc64   :  { %2344 = vmatmul.mubr.msk.f32.vlgmr.msra.gmra.mxu1 %vm165_vm2, %v1738_v36 }
 0xc65   :  { %v2340_v11 = vpop.f32.mrf.mxu0 }
 0xd24   :  { %v2345_v0 = vpop.f32.mrf.mxu1 }
 0xd25   :  { %v1828_v37 = vadd.f32 %v2345_v0, %v1411_v15 }
 0xd26   :  { %v1818_v38 = vpop.f32.mrf.mxu1 }
 0xd27   :  { %v1827_v39 = vadd.f32 %v1818_v38, %v1410_v17  ;;  %v1830_v40 = vadd.f32 %v1828_v37, %v2586_v5 }
 0xd29   :  { %v1834_v41 = vsel %vm76_vm0, %v1830_v40, 0.0  ;;  %v1829_v42 = vadd.f32 %v1827_v39, %v2575_v2  ;;  %v62_v2 = vld [vmem:[#allocation5 + $0x28] sm:$0xff] }
 0xd2a   :  { %1835 = vadd.xlane.f32.xlu1 %v1834_v41  ;;  %2348 = vmatprep.subr.mxu0 %v62_v2 }
 0xd2b   :  { %v1831_v43 = vsel %vm76_vm0, %v1829_v42, 0.0  ;;  %2349 = vmatpush3.msra.mxu0 %v62_v2 }
 0xd2c   :  { %1832 = vadd.xlane.f32.xlu0 %v1831_v43  ;;  %2350 = vmatprep.subr.mxu0 %v61_v53 }
 0xd2d   :  { %2351 = vmatpush3.msra.mxu0 %v61_v53 }
 0xd2e   :  { %2352 = vmatprep.subr.mxu0 %v60_v54 }
 0xd2f   :  { %2353 = vmatpush3.msra.mxu0 %v60_v54 }
 0xd3b   :  { %1971 = vrot.lane.b32.xlu1 %v63_v52, %s2532_s8 }
 0xd3f   :  { %1967 = vrot.lane.b32.xlu1 %v61_v53, %s2532_s8 }
 0xd43   :  { %1965 = vrot.lane.b32.xlu1 %v60_v54, %s2532_s8 }
 0xdb3   :  { %v1836_v44 = vpop.xlane.xlu1 %1835 }
 0xdb4   :  { %v1839_v45 = vmul.f32 0.03125, %v1836_v44 }
 0xdb5   :  { %v1833_v46 = vpop.xlane.xlu0 %1832 }
 0xdb6   :  { %v1838_v47 = vmul.f32 0.03125, %v1833_v46  ;;  %v1841_v48 = vsub.f32 %v1830_v40, %v1839_v45 }
 0xdb7   :  { %v1972_v55 = vpop.permute.xlu1 %1971 }
 0xdb8   :  { %v1840_v49 = vsub.f32 %v1829_v42, %v1838_v47  ;;  %v1843_v51 = vmul.f32 %v1841_v48, %v1841_v48  ;;  %2357 = vmatprep.subr.msk.mxu1 %vm1973_vm3, %v1972_v55  ;;  %v2171_v47 = vld [vmem:[#allocation7 + $0x6] ss:$0 sm:$0xff] }
 0xdb9   :  { %2358 = vmatpush3.xpose.msk.msra.mxu1 %vm1973_vm3, %v1972_v55 }
 0xdba   :  { %v1842_v50 = vmul.f32 %v1840_v49, %v1840_v49  ;;  %v1847_v5 = vsel %vm76_vm0, %v1843_v51, 0.0 }
 0xdbb   :  { %v1968_v63 = vpop.permute.xlu1 %1967 }
 0xdbc   :  { %v1844_v1 = vsel %vm76_vm0, %v1842_v50, 0.0 }
 0xdbd   :  { %1845 = vadd.xlane.f32.xlu0 %v1844_v1 }
 0xdbf   :  { %v1966_v18 = vpop.permute.xlu1 %1965 }
 0xdc1   :  { %1848 = vadd.xlane.f32.xlu0 %v1847_v5 }
 0xdd7   :  { %1969 = vrot.lane.b32.xlu0 %v62_v2, %s2532_s8 }
 0xe46   :  { %v1846_v56 = vpop.xlane.xlu0 %1845 }
 0xe47   :  { %v1850_v57 = vmul.f32 0.03125, %v1846_v56 }
 0xe49   :  { %v1852_v58 = vadd.f32 1e-05, %v1850_v57 }
 0xe4a   :  { %v1849_v59 = vpop.xlane.xlu0 %1848 }
 0xe4b   :  { %2422 = vrsqrt.f32 %v1852_v58  ;;  %v1851_v60 = vmul.f32 0.03125, %v1849_v59 }
 0xe4d   :  { %v1853_v61 = vadd.f32 1e-05, %v1851_v60 }
 0xe4e   :  { %v1970_v62 = vpop.permute.xlu0 %1969 }
 0xe4f   :  { %2424 = vrsqrt.f32 %v1853_v61  ;;  %2359 = vmatprep.subr.msk.mxu1 %vm1973_vm3, %v1970_v62 }
 0xe50   :  { %2360 = vmatpush3.xpose.msk.msra.mxu1 %vm1973_vm3, %v1970_v62 }
 0xe51   :  { %2361 = vmatprep.subr.msk.mxu1 %vm1973_vm3, %v1968_v63 }
 0xe54   :  { %2362 = vmatpush3.xpose.msk.msra.mxu1 %vm1973_vm3, %v1968_v63 }
 0xe55   :  { %2363 = vmatprep.subr.msk.mxu1 %vm1973_vm3, %v1966_v18 }
 0xe58   :  { %v2423_v4 = vpop.eup %2422  ;;  %2364 = vmatpush3.xpose.msk.msra.mxu1 %vm1973_vm3, %v1966_v18 }
 0xe59   :  { %v1856_v8 = vmul.f32 %v2423_v4, %v1840_v49  ;;  %v2172_v49 = vld [vmem:[#allocation7 + $0x7] ss:$0 sm:$0xff] }
 0xe5b   :  { %v1862_v12 = vmul.f32 %v2159_v7, %v1856_v8 }
 0xe5c   :  { %v2425_v13 = vpop.eup %2424 }
 0xe5d   :  { %v1857_v14 = vmul.f32 %v2425_v13, %v1841_v48  ;;  %v1868_v15 = vadd.f32 %v2160_v9, %v1862_v12 }
 0xe5f   :  { %v1863_v16 = vmul.f32 %v2159_v7, %v1857_v14  ;;  %2354 = vmatprep.mubr.msk.f32.mxu0 %vm76_vm0, %v1868_v15 }
 0xe61   :  { %v1869_v17 = vadd.f32 %v2160_v9, %v1863_v16 }
 0xe63   :  { %2355 = vmatmul.mubr.msk.f32.vlgmr.msra.gmra.mxu0 %vm76_vm0, %v1869_v17 }
 0xf23   :  { %v2356_v19 = vpop.f32.mrf.mxu0 }
 0xf24   :  { %v1952_v20 = vadd.f32 %v2356_v19, %v2161_v3 }
 0xf25   :  { %v1946_v21 = vpop.f32.mrf.mxu0 }
 0xf26   :  { %v1947_v6 = vadd.f32 %v2161_v3, %v1946_v21  ;;  %v1956_v23 = vmax.f32 %v1952_v20, 0.0 }
 0xf28   :  { %v1955_v22 = vmax.f32 %v1947_v6, 0.0 }
 0xf2a   :  { %2365 = vmatprep.mubr.msk.f32.mxu1 %vm1973_vm3, %v1955_v22 }
 0xf2b   :  { %2366 = vmatmul.mubr.msk.f32.vlgmr.msra.gmra.mxu1 %vm1973_vm3, %v1956_v23 }
 0xfeb   :  { %v2367_v25 = vpop.f32.mrf.mxu1 }
 0xfec   :  { %v2060_v26 = vadd.f32 %v2367_v25, %v2164_v24 }
 0xfed   :  { %v2054_v27 = vpop.f32.mrf.mxu1 }
 0xfee   :  { %v2055_v28 = vadd.f32 %v2164_v24, %v2054_v27  ;;  %v2064_v29 = vadd.f32 %v2060_v26, %v1869_v17 }
 0xff0   :  { %v2068_v10 = vsel %vm76_vm0, %v2064_v29, 0.0  ;;  %v2063_v30 = vadd.f32 %v2055_v28, %v1868_v15 }
 0xff1   :  { %2069 = vadd.xlane.f32.xlu1 %v2068_v10 }
 0xff2   :  { %v2065_v31 = vsel %vm76_vm0, %v2063_v30, 0.0 }
 0xff3   :  { %2066 = vadd.xlane.f32.xlu0 %v2065_v31 }
0x107a   :  { %v2070_v32 = vpop.xlane.xlu1 %2069 }
0x107b   :  { %v2072_v33 = vmul.f32 0.03125, %v2070_v32 }
0x107c   :  { %v2067_v34 = vpop.xlane.xlu0 %2066 }
0x107d   :  { %v2071_v35 = vmul.f32 0.03125, %v2067_v34  ;;  %v2074_v36 = vsub.f32 %v2064_v29, %v2072_v33 }
0x107f   :  { %v2073_v11 = vsub.f32 %v2063_v30, %v2071_v35  ;;  %v2076_v38 = vmul.f32 %v2074_v36, %v2074_v36 }
0x1081   :  { %v2075_v0 = vmul.f32 %v2073_v11, %v2073_v11  ;;  %v2080_v39 = vsel %vm76_vm0, %v2076_v38, 0.0 }
0x1083   :  { %v2077_v37 = vsel %vm76_vm0, %v2075_v0, 0.0 }
0x1084   :  { %2078 = vadd.xlane.f32.xlu0 %v2077_v37 }
0x1088   :  { %2081 = vadd.xlane.f32.xlu0 %v2080_v39 }
0x110d   :  { %v2079_v40 = vpop.xlane.xlu0 %2078 }
0x110e   :  { %v2083_v41 = vmul.f32 0.03125, %v2079_v40 }
0x1110   :  { %v2085_v42 = vadd.f32 1e-05, %v2083_v41 }
0x1111   :  { %v2082_v43 = vpop.xlane.xlu0 %2081 }
0x1112   :  { %2426 = vrsqrt.f32 %v2085_v42  ;;  %v2084_v44 = vmul.f32 0.03125, %v2082_v43 }
0x1114   :  { %v2086_v45 = vadd.f32 1e-05, %v2084_v44 }
0x1116   :  { %2428 = vrsqrt.f32 %v2086_v45 }
0x111f   :  { %v2427_v46 = vpop.eup %2426 }
0x1120   :  { %v2089_v48 = vmul.f32 %v2427_v46, %v2073_v11 }
0x1122   :  { %v2095_v50 = vmul.f32 %v2171_v47, %v2089_v48 }
0x1123   :  { %v2429_v1 = vpop.eup %2428 }
0x1124   :  { %v2090_v51 = vmul.f32 %v2429_v1, %v2074_v36  ;;  %v2101_v5 = vadd.f32 %v2172_v49, %v2095_v50 }
0x1126   :  { %v2096_v52 = vmul.f32 %v2171_v47, %v2090_v51  ;;  %2103 = vst.msk [vmem:[#allocation8] sm:$0xff] %vm76_vm0, %v2101_v5 }
0x1128   :  { %v2102_v2 = vadd.f32 %v2172_v49, %v2096_v52 }
0x112a   :  { %2104 = vst.msk [vmem:[#allocation8 + $0x8] sm:$0xff] %vm76_vm0, %v2102_v2 }
0x112b   :  { %2501 = shalt.err (!%p2498_p5)
}
0x112c   :  { %2116 = dma.vmem_to_hbm [thread:$0]  %s2111_s14, 256, %s2772_s3, [#allocation4], %s2520_s22, %s2520_s22, %s2521_s23  }
0x112d   :  { %2514 = dma.done.wait [#allocation4], 256  }
0x112e   :  { %2515 = vsyncadd [#allocation4], 4294967040 }
0x112f   :  { %2120 = vsyncpa [#allocation3], 1 }
0x1130   :  { %2121 = vsyncpa [#allocation6], 1 }
0x1131   :  { %2122 = vsyncpa [#allocation4], 1 }

</bundles_post_ra>
